<compile_context>
chip_gen: v5e
topology: v5e:2x2
jax: 0.10.0
libtpu: 0.0.40
codegen_flags: <defaults>
</compile_context>

<pallas_src>
from functools import partial

import jax
import jax.numpy as jnp
from jax import lax
from jax.experimental import pallas as pl
from jax.experimental.pallas import tpu as pltpu


def _round_up(x, m):
    return ((x + m - 1) // m) * m


def _base_conv_kernel(*refs, K, Cin_p, Wp, Lout, n_valid, eps, act, has_bias):
    # refs (has_bias=False): x, w, gamma, beta, mask, out, patches_scratch
    # refs (has_bias=True):  x, w, bias, gamma, beta, mask, out, patches_scratch
    if has_bias:
        x_ref, w_ref, b_ref, g_ref, beta_ref, mask_ref, o_ref, patches_ref = refs
    else:
        x_ref, w_ref, g_ref, beta_ref, mask_ref, o_ref, patches_ref = refs
        b_ref = None

    x = x_ref[0]                                           # (Cin_p, Lin), matmul dtype

    # --- im2col: write each tap straight into its row block of the scratch -----
    # Output column l = h*Wp + w; tap (kh, kw) reads padded pixel (h+kh, w+kw),
    # i.e. a static lane-offset slice of the flattened padded grid.
    for t in range(K * K):
        kh, kw = t // K, t % K
        off = kh * Wp + kw
        patches_ref[t * Cin_p:(t + 1) * Cin_p, :] = x[:, off:off + Lout]

    # --- convolution: one MXU matmul, contraction = K*K*Cin_p ------------------
    y = jnp.dot(w_ref[...], patches_ref[...],
                preferred_element_type=jnp.float32)        # (Cout, Lout), f32
    if has_bias:
        y = y + b_ref[...]                                 # (Cout, 1) broadcast

    # --- LayerNorm over (C, H, W): fused one-pass masked statistics ------------
    m = mask_ref[...]                                      # (1, Lout)
    inv_n = 1.0 / n_valid
    ym = y * m
    mean = jnp.sum(ym) * inv_n
    var = jnp.sum(ym * ym) * inv_n - mean * mean           # biased variance
    rstd = lax.rsqrt(var + eps)
    z = (y - mean) * rstd * g_ref[...] + beta_ref[...]

    # --- activation (static dispatch; module default 'silu') -------------------
    if act == 'silu':
        z = z * jax.nn.sigmoid(z)
    elif act == 'relu':
        z = jnp.maximum(z, 0.0)
    elif act == 'lrelu':
        z = jnp.where(z > 0, z, 0.2 * z)
    elif act == 'gelu':
        z = jax.nn.gelu(z, approximate=False)
    elif act == 'sigmoid':
        z = jax.nn.sigmoid(z)
    elif act not in ('', None):
        raise ValueError('Unsupported act type: {}'.format(act))

    o_ref[0] = z.astype(o_ref.dtype)


def make_base_conv(conv_w, conv_b, ln_gamma, ln_beta, *, ksize, stride=1,
                   groups=1, eps=1e-5, act='silu', matmul_dtype=jnp.bfloat16,
                   out_layout='nchw'):
    """Build BaseConv forward: Conv2d('same') -> LayerNorm([C,H,W]) -> act.

    Parameter preprocessing happens once here (hoisted out of the per-call path);
    the returned jitted callable takes an NCHW input.
    """
    # TODO(synk): stride > 1 and grouped conv (groups > 1) are not implemented
    #             (module demo path uses stride=1, groups=1, bias=False).
    assert stride == 1 and groups == 1
    assert out_layout in ('nchw', 'padded')

    Cout, Cin, K, K2 = conv_w.shape
    assert K == K2 == ksize
    Cg, H, W = ln_gamma.shape
    assert Cg == Cout and ln_beta.shape == ln_gamma.shape

    pad = (K - 1) // 2
    Hp, Wp = H + 2 * pad, W + 2 * pad
    HWp = H * Wp

    mm_dtype = jnp.dtype(matmul_dtype)
    chan_align = 8 * (4 // mm_dtype.itemsize)        # 8 for f32, 16 for bf16
    Cin_p = _round_up(Cin, chan_align)
    KKC = K * K * Cin_p
    Lout = _round_up(HWp, 128)                       # lane-dense output width

    # Flattened padded-grid input length: taps reach up to (K-1)*Wp + (K-1) past the
    # start of the last output column; extra zero rows at the bottom (folded into the
    # single fused pad below) provide the tail.
    need = (K - 1) * Wp + (K - 1) + Lout
    extra_rows = -(-max(need - Hp * Wp, 0) // Wp)
    Hp_ext = Hp + extra_rows
    Lin = Hp_ext * Wp

    f32 = jnp.float32

    # ---- parameters prepared ONCE (not per call) -------------------------------
    # Weights -> single contiguous 2-D MXU operand, rows ordered (kh, kw, cin).
    w4 = jnp.transpose(conv_w, (0, 2, 3, 1)).astype(mm_dtype)       # (Cout,K,K,Cin)
    w4 = jnp.pad(w4, ((0, 0), (0, 0), (0, 0), (0, Cin_p - Cin)))
    w2 = w4.reshape(Cout, KKC)

    has_bias = conv_b is not None
    b2 = conv_b.astype(f32).reshape(Cout, 1) if has_bias else None

    def to_padgrid(p):
        p = jnp.pad(p.astype(f32).reshape(Cout, H, W),
                    ((0, 0), (0, 0), (0, Wp - W)))
        return jnp.pad(p.reshape(Cout, HWp), ((0, 0), (0, Lout - HWp)))

    g2 = to_padgrid(ln_gamma)
    beta2 = to_padgrid(ln_beta)

    col = jnp.arange(Lout)
    mask = (((col % Wp) < W) & (col < HWp)).astype(f32).reshape(1, Lout)

    # ---- untiled per-sample VMEM working-set guard ------------------------------
    VMEM_LIMIT = 32 * 1024 * 1024
    est = (2 * Cin_p * Lin * mm_dtype.itemsize       # input block (double-buffered)
           + KKC * Lout * mm_dtype.itemsize          # im2col scratch
           + Cout * KKC * mm_dtype.itemsize          # weights
           + (2 * Cout + 1) * Lout * 4               # gamma, beta, mask
           + 2 * Cout * Lout * 4                     # output block (double-buffered)
           + 4 * Cout * Lout * 4)                    # y/z live temporaries (rough)
    if est > VMEM_LIMIT - 4 * 1024 * 1024:
        # TODO(synk): production 500x500 shapes need a row-tiled kernel: row-tile grid
        #             axis with a (K-1) halo, gamma/beta/mask/output streamed with the
        #             same row index_map, two-pass LayerNorm (pass 1 accumulates
        #             sum/sum-sq, row axis "arbitrary"), bf16 operands, and
        #             per-generation tile / vmem budgets (v7x has only 64 MiB VMEM;
        #             v5e/v6e can keep the per-sample conv output resident instead).
        raise NotImplementedError(
            'per-sample working set ~%d MiB exceeds the untiled VMEM budget; '
            'a row-tiled two-pass LayerNorm kernel is required for this shape'
            % (est >> 20))

    kernel = partial(_base_conv_kernel, K=K, Cin_p=Cin_p, Wp=Wp, Lout=Lout,
                     n_valid=float(Cout * H * W), eps=eps, act=act,
                     has_bias=has_bias)

    in_specs = [pl.BlockSpec((1, Cin_p, Lin), lambda n: (n, 0, 0)),
                pl.BlockSpec((Cout, KKC), lambda n: (0, 0))]
    if has_bias:
        in_specs.append(pl.BlockSpec((Cout, 1), lambda n: (0, 0)))
    in_specs += [pl.BlockSpec((Cout, Lout), lambda n: (0, 0)),
                 pl.BlockSpec((Cout, Lout), lambda n: (0, 0)),
                 pl.BlockSpec((1, Lout), lambda n: (0, 0))]

    @jax.jit
    def apply(x_nchw):
        N, Cx, Hx, Wx = x_nchw.shape
        assert (Cx, Hx, Wx) == (Cin, H, W)

        # Glue: ONE fused pad (channel pad + spatial halo + bottom extension rows),
        # already in the matmul dtype; the reshape just merges contiguous dims.
        xp = jnp.pad(x_nchw.astype(mm_dtype),
                     ((0, 0), (0, Cin_p - Cin),
                      (pad, pad + extra_rows), (pad, pad)))
        xflat = xp.reshape(N, Cin_p, Lin)

        args = [xflat, w2] + ([b2] if has_bias else []) + [g2, beta2, mask]

        out_flat = pl.pallas_call(
            kernel,
            out_shape=jax.ShapeDtypeStruct((N, Cout, Lout), f32),
            grid=(N,),
            in_specs=in_specs,
            out_specs=pl.BlockSpec((1, Cout, Lout), lambda n: (n, 0, 0)),
            scratch_shapes=[pltpu.VMEM((KKC, Lout), mm_dtype)],
            compiler_params=pltpu.CompilerParams(
                dimension_semantics=("parallel",),   # independent samples -> 2 TCs on v7x
                vmem_limit_bytes=VMEM_LIMIT,
            ),
        )(*args)

        if out_layout == 'padded':
            # Lane-dense (N, Cout, Lout) padded-grid layout (column h*Wp + w, valid
            # where w < W); skips the NCHW epilogue copy for downstream consumers.
            return out_flat
        # NCHW module semantics: drop the padded-grid garbage columns.
        return out_flat[:, :, :HWp].reshape(N, Cout, H, Wp)[:, :, :, :W]

    return apply


def _reference(x_nchw, conv_w, conv_b, gamma, beta, ksize, eps=1e-5):
    """Pure-JAX reference: Conv2d(bias opt) -> LayerNorm([C,H,W]) -> SiLU."""
    pad = (ksize - 1) // 2
    y = lax.conv_general_dilated(
        x_nchw, conv_w, window_strides=(1, 1),
        padding=((pad, pad), (pad, pad)),
        dimension_numbers=('NCHW', 'OIHW', 'NCHW'),
        precision=lax.Precision.HIGHEST)
    if conv_b is not None:
        y = y + conv_b.reshape(1, -1, 1, 1)
    N = y.shape[0]
    yf = y.reshape(N, -1)
    mean = jnp.mean(yf, axis=1, keepdims=True)
    var = jnp.mean(jnp.square(yf - mean), axis=1, keepdims=True)   # biased
    yn = ((yf - mean) * lax.rsqrt(var + eps)).reshape(y.shape)
    z = yn * gamma[None] + beta[None]
    return z * jax.nn.sigmoid(z)                                    # SiLU


if __name__ == "__main__":
    key = jax.random.PRNGKey(0)
    k1, k2, k3, k4 = jax.random.split(key, 4)

    # Small shapes consistent with BaseConv's forward (NCHW input, 16 out-channels
    # to match the LayerNorm channel count; spatial kept small for the test).
    N, Cin, H, W = 2, 4, 16, 16
    Cout, K = 16, 3

    x = jax.random.normal(k1, (N, Cin, H, W), jnp.float32)
    conv_w = 0.1 * jax.random.normal(k2, (Cout, Cin, K, K), jnp.float32)
    conv_b = None                                    # BaseConv default: bias=False
    ln_gamma = 1.0 + 0.1 * jax.random.normal(k3, (Cout, H, W), jnp.float32)
    ln_beta = 0.1 * jax.random.normal(k4, (Cout, H, W), jnp.float32)

    base_conv = make_base_conv(conv_w, conv_b, ln_gamma, ln_beta,
                               ksize=K, stride=1, act='silu')
    out = jax.block_until_ready(base_conv(x))
    assert out.shape == (N, Cout, H, W)

    # Tight check against a precision-matched reference (conv inputs rounded to the
    # kernel's bf16 matmul dtype, f32 accumulation): verifies the kernel logic.
    xm = x.astype(jnp.bfloat16).astype(jnp.float32)
    wm = conv_w.astype(jnp.bfloat16).astype(jnp.float32)
    ref_matched = _reference(xm, wm, conv_b, ln_gamma, ln_beta, K)
    assert jnp.allclose(out, ref_matched, rtol=1e-3, atol=1e-3), \
        float(jnp.max(jnp.abs(out - ref_matched)))

    # Sanity check against the full-f32 reference (bounds the bf16 MXU rounding).
    ref_f32 = _reference(x, conv_w, conv_b, ln_gamma, ln_beta, K)
    assert jnp.allclose(out, ref_f32, rtol=5e-2, atol=5e-2), \
        float(jnp.max(jnp.abs(out - ref_f32)))

    print("KERNEL_OK")
</pallas_src>

<mosaic_0001>
module attributes {stable_mosaic.version = 11 : i64} {
  func.func @_base_conv_kernel(%arg0: i32, %arg1: memref<1x16x432xbf16, #tpu.memory_space<vmem>>, %arg2: memref<16x144xbf16, #tpu.memory_space<vmem>>, %arg3: memref<16x384xf32, #tpu.memory_space<vmem>>, %arg4: memref<16x384xf32, #tpu.memory_space<vmem>>, %arg5: memref<1x384xf32, #tpu.memory_space<vmem>>, %arg6: memref<1x16x384xf32, #tpu.memory_space<vmem>>, %arg7: memref<144x384xbf16, #tpu.memory_space<vmem>>) attributes {dimension_semantics = [#tpu.dimension_semantics<parallel>], iteration_bounds = array<i64: 2>, scalar_prefetch = 0 : i64, scratch_operands = 1 : i64, tpu.core_type = #tpu.core_type<tc>, window_params = [{transform_indices = @transform_0, window_bounds = array<i64: 1, 16, 432>}, {pipeline_mode = #tpu.pipeline_mode<synchronous>, transform_indices = @transform_1, window_bounds = array<i64: 16, 144>}, {pipeline_mode = #tpu.pipeline_mode<synchronous>, transform_indices = @transform_2, window_bounds = array<i64: 16, 384>}, {pipeline_mode = #tpu.pipeline_mode<synchronous>, transform_indices = @transform_3, window_bounds = array<i64: 16, 384>}, {pipeline_mode = #tpu.pipeline_mode<synchronous>, transform_indices = @transform_4, window_bounds = array<i64: 1, 384>}, {transform_indices = @transform_5, window_bounds = array<i64: 1, 16, 384>}]} {
    %c0 = arith.constant 0 : index
    %c0_0 = arith.constant 0 : index
    %c0_1 = arith.constant 0 : index
    %0 = vector.load %arg1[%c0, %c0_0, %c0_1] : memref<1x16x432xbf16, #tpu.memory_space<vmem>>, vector<1x16x432xbf16>
    %1 = vector.shape_cast %0 : vector<1x16x432xbf16> to vector<16x432xbf16>
    %2 = vector.extract_strided_slice %1 {offsets = [0, 0], sizes = [16, 384], strides = [1, 1]} : vector<16x432xbf16> to vector<16x384xbf16>
    %c0_2 = arith.constant 0 : index
    %c0_3 = arith.constant 0 : index
    %3 = vector.load %arg7[%c0_2, %c0_3] : memref<144x384xbf16, #tpu.memory_space<vmem>>, vector<16x384xbf16>
    tpu.vector_store %arg7[%c0_2, %c0_3], %2 {strides = array<i32>} : memref<144x384xbf16, #tpu.memory_space<vmem>>, vector<16x384xbf16>,
    %4 = vector.extract_strided_slice %1 {offsets = [0, 1], sizes = [16, 384], strides = [1, 1]} : vector<16x432xbf16> to vector<16x384xbf16>
    %c16 = arith.constant 16 : index
    %c0_4 = arith.constant 0 : index
    %5 = vector.load %arg7[%c16, %c0_4] : memref<144x384xbf16, #tpu.memory_space<vmem>>, vector<16x384xbf16>
    tpu.vector_store %arg7[%c16, %c0_4], %4 {strides = array<i32>} : memref<144x384xbf16, #tpu.memory_space<vmem>>, vector<16x384xbf16>,
    %6 = vector.extract_strided_slice %1 {offsets = [0, 2], sizes = [16, 384], strides = [1, 1]} : vector<16x432xbf16> to vector<16x384xbf16>
    %c32 = arith.constant 32 : index
    %c0_5 = arith.constant 0 : index
    %7 = vector.load %arg7[%c32, %c0_5] : memref<144x384xbf16, #tpu.memory_space<vmem>>, vector<16x384xbf16>
    tpu.vector_store %arg7[%c32, %c0_5], %6 {strides = array<i32>} : memref<144x384xbf16, #tpu.memory_space<vmem>>, vector<16x384xbf16>,
    %8 = vector.extract_strided_slice %1 {offsets = [0, 18], sizes = [16, 384], strides = [1, 1]} : vector<16x432xbf16> to vector<16x384xbf16>
    %c48 = arith.constant 48 : index
    %c0_6 = arith.constant 0 : index
    %9 = vector.load %arg7[%c48, %c0_6] : memref<144x384xbf16, #tpu.memory_space<vmem>>, vector<16x384xbf16>
    tpu.vector_store %arg7[%c48, %c0_6], %8 {strides = array<i32>} : memref<144x384xbf16, #tpu.memory_space<vmem>>, vector<16x384xbf16>,
    %10 = vector.extract_strided_slice %1 {offsets = [0, 19], sizes = [16, 384], strides = [1, 1]} : vector<16x432xbf16> to vector<16x384xbf16>
    %c64 = arith.constant 64 : index
    %c0_7 = arith.constant 0 : index
    %11 = vector.load %arg7[%c64, %c0_7] : memref<144x384xbf16, #tpu.memory_space<vmem>>, vector<16x384xbf16>
    tpu.vector_store %arg7[%c64, %c0_7], %10 {strides = array<i32>} : memref<144x384xbf16, #tpu.memory_space<vmem>>, vector<16x384xbf16>,
    %12 = vector.extract_strided_slice %1 {offsets = [0, 20], sizes = [16, 384], strides = [1, 1]} : vector<16x432xbf16> to vector<16x384xbf16>
    %c80 = arith.constant 80 : index
    %c0_8 = arith.constant 0 : index
    %13 = vector.load %arg7[%c80, %c0_8] : memref<144x384xbf16, #tpu.memory_space<vmem>>, vector<16x384xbf16>
    tpu.vector_store %arg7[%c80, %c0_8], %12 {strides = array<i32>} : memref<144x384xbf16, #tpu.memory_space<vmem>>, vector<16x384xbf16>,
    %14 = vector.extract_strided_slice %1 {offsets = [0, 36], sizes = [16, 384], strides = [1, 1]} : vector<16x432xbf16> to vector<16x384xbf16>
    %c96 = arith.constant 96 : index
    %c0_9 = arith.constant 0 : index
    %15 = vector.load %arg7[%c96, %c0_9] : memref<144x384xbf16, #tpu.memory_space<vmem>>, vector<16x384xbf16>
    tpu.vector_store %arg7[%c96, %c0_9], %14 {strides = array<i32>} : memref<144x384xbf16, #tpu.memory_space<vmem>>, vector<16x384xbf16>,
    %16 = vector.extract_strided_slice %1 {offsets = [0, 37], sizes = [16, 384], strides = [1, 1]} : vector<16x432xbf16> to vector<16x384xbf16>
    %c112 = arith.constant 112 : index
    %c0_10 = arith.constant 0 : index
    %17 = vector.load %arg7[%c112, %c0_10] : memref<144x384xbf16, #tpu.memory_space<vmem>>, vector<16x384xbf16>
    tpu.vector_store %arg7[%c112, %c0_10], %16 {strides = array<i32>} : memref<144x384xbf16, #tpu.memory_space<vmem>>, vector<16x384xbf16>,
    %18 = vector.extract_strided_slice %1 {offsets = [0, 38], sizes = [16, 384], strides = [1, 1]} : vector<16x432xbf16> to vector<16x384xbf16>
    %c128 = arith.constant 128 : index
    %c0_11 = arith.constant 0 : index
    %19 = vector.load %arg7[%c128, %c0_11] : memref<144x384xbf16, #tpu.memory_space<vmem>>, vector<16x384xbf16>
    tpu.vector_store %arg7[%c128, %c0_11], %18 {strides = array<i32>} : memref<144x384xbf16, #tpu.memory_space<vmem>>, vector<16x384xbf16>,
    %c0_12 = arith.constant 0 : index
    %c0_13 = arith.constant 0 : index
    %20 = vector.load %arg2[%c0_12, %c0_13] : memref<16x144xbf16, #tpu.memory_space<vmem>>, vector<16x144xbf16>
    %c0_14 = arith.constant 0 : index
    %c0_15 = arith.constant 0 : index
    %21 = vector.load %arg7[%c0_14, %c0_15] : memref<144x384xbf16, #tpu.memory_space<vmem>>, vector<144x384xbf16>
    %cst = arith.constant dense<0.000000e+00> : vector<16x384xf32>
    %22 = tpu.matmul %20, %21, %cst {dimension_numbers = #tpu.dot_dimension_numbers<[1], [0], [0], [1], [0, 0, 1, 1], [], []>} : vector<16x144xbf16>, vector<144x384xbf16>, vector<16x384xf32> -> vector<16x384xf32>
    %c0_16 = arith.constant 0 : index
    %c0_17 = arith.constant 0 : index
    %23 = vector.load %arg5[%c0_16, %c0_17] : memref<1x384xf32, #tpu.memory_space<vmem>>, vector<1x384xf32>
    %24 = vector.broadcast %23 : vector<1x384xf32> to vector<16x384xf32>
    %25 = arith.mulf %22, %24 : vector<16x384xf32>
    %26 = vector.shape_cast %25 : vector<16x384xf32> to vector<1x16x384xf32>
    %cst_18 = arith.constant dense<0.000000e+00> : vector<1xf32>
    %27 = vector.multi_reduction <add>, %26, %cst_18 [1, 2] : vector<1x16x384xf32> to vector<1xf32>
    %28 = vector.shape_cast %27 : vector<1xf32> to vector<1x1x1xf32>
    %29 = vector.extract %28[0, 0, 0] : f32 from vector<1x1x1xf32>
    %cst_19 = arith.constant 2.44140625E-4 : f32
    %30 = arith.mulf %29, %cst_19 : f32
    %31 = arith.mulf %25, %25 : vector<16x384xf32>
    %32 = vector.shape_cast %31 : vector<16x384xf32> to vector<1x16x384xf32>
    %cst_20 = arith.constant dense<0.000000e+00> : vector<1xf32>
    %33 = vector.multi_reduction <add>, %32, %cst_20 [1, 2] : vector<1x16x384xf32> to vector<1xf32>
    %34 = vector.shape_cast %33 : vector<1xf32> to vector<1x1x1xf32>
    %35 = vector.extract %34[0, 0, 0] : f32 from vector<1x1x1xf32>
    %cst_21 = arith.constant 2.44140625E-4 : f32
    %36 = arith.mulf %35, %cst_21 : f32
    %37 = arith.mulf %30, %30 : f32
    %38 = arith.subf %36, %37 : f32
    %cst_22 = arith.constant 9.99999974E-6 : f32
    %39 = arith.addf %38, %cst_22 : f32
    %40 = math.rsqrt %39 : f32
    %41 = vector.broadcast %30 : f32 to vector<16x384xf32>
    %42 = arith.subf %22, %41 : vector<16x384xf32>
    %43 = vector.broadcast %40 : f32 to vector<16x384xf32>
    %44 = arith.mulf %42, %43 : vector<16x384xf32>
    %c0_23 = arith.constant 0 : index
    %c0_24 = arith.constant 0 : index
    %45 = vector.load %arg3[%c0_23, %c0_24] : memref<16x384xf32, #tpu.memory_space<vmem>>, vector<16x384xf32>
    %46 = arith.mulf %44, %45 : vector<16x384xf32>
    %c0_25 = arith.constant 0 : index
    %c0_26 = arith.constant 0 : index
    %47 = vector.load %arg4[%c0_25, %c0_26] : memref<16x384xf32, #tpu.memory_space<vmem>>, vector<16x384xf32>
    %48 = arith.addf %46, %47 : vector<16x384xf32>
    %49 = arith.negf %48 : vector<16x384xf32>
    %50 = math.exp %49 : vector<16x384xf32>
    %cst_27 = arith.constant 1.000000e+00 : f32
    %51 = vector.broadcast %cst_27 : f32 to vector<16x384xf32>
    %52 = arith.addf %51, %50 : vector<16x384xf32>
    %53 = arith.divf %51, %52 : vector<16x384xf32>
    %54 = arith.mulf %48, %53 : vector<16x384xf32>
    %c0_28 = arith.constant 0 : index
    %c0_29 = arith.constant 0 : index
    %c0_30 = arith.constant 0 : index
    %55 = vector.load %arg6[%c0_28, %c0_29, %c0_30] : memref<1x16x384xf32, #tpu.memory_space<vmem>>, vector<1x16x384xf32>
    %56 = vector.shape_cast %55 : vector<1x16x384xf32> to vector<16x384xf32>
    %57 = vector.shape_cast %54 : vector<16x384xf32> to vector<1x16x384xf32>
    tpu.vector_store %arg6[%c0_28, %c0_29, %c0_30], %57 {strides = array<i32>} : memref<1x16x384xf32, #tpu.memory_space<vmem>>, vector<1x16x384xf32>,
    return
  }
  func.func @transform_0(%arg0: i32) -> (i32, i32, i32) {
    %c0_i32 = arith.constant 0 : i32
    %c0_i32_0 = arith.constant 0 : i32
    %c0_i32_1 = arith.constant 0 : i32
    return %arg0, %c0_i32, %c0_i32_0 : i32, i32, i32
  }
  func.func @transform_1(%arg0: i32) -> (i32, i32) {
    %c0_i32 = arith.constant 0 : i32
    %c0_i32_0 = arith.constant 0 : i32
    %c0_i32_1 = arith.constant 0 : i32
    return %c0_i32, %c0_i32_0 : i32, i32
  }
  func.func @transform_2(%arg0: i32) -> (i32, i32) {
    %c0_i32 = arith.constant 0 : i32
    %c0_i32_0 = arith.constant 0 : i32
    %c0_i32_1 = arith.constant 0 : i32
    return %c0_i32, %c0_i32_0 : i32, i32
  }
  func.func @transform_3(%arg0: i32) -> (i32, i32) {
    %c0_i32 = arith.constant 0 : i32
    %c0_i32_0 = arith.constant 0 : i32
    %c0_i32_1 = arith.constant 0 : i32
    return %c0_i32, %c0_i32_0 : i32, i32
  }
  func.func @transform_4(%arg0: i32) -> (i32, i32) {
    %c0_i32 = arith.constant 0 : i32
    %c0_i32_0 = arith.constant 0 : i32
    %c0_i32_1 = arith.constant 0 : i32
    return %c0_i32, %c0_i32_0 : i32, i32
  }
  func.func @transform_5(%arg0: i32) -> (i32, i32, i32) {
    %c0_i32 = arith.constant 0 : i32
    %c0_i32_0 = arith.constant 0 : i32
    %c0_i32_1 = arith.constant 0 : i32
    return %arg0, %c0_i32, %c0_i32_0 : i32, i32, i32
  }
}

</mosaic_0001>

<bundles_post_ra>
// kernel: apply.1
= control target key start
LH: loop header
LB: loop body
LE: loop exit
PB: predicated region body
PF: predicated region fallthrough
CT: control target
= control target key end

     0   :  { %s1278_s18 = smov 0   ;;  %s1555_s0 = inlined_call_operand.vmem [shape: bf16[2,16,432], index: 0, kind: input, shape index: {}]   ;;  %s1556_s1 = inlined_call_operand.vmem [shape: bf16[16,144], index: 1, kind: input, shape index: {}]   ;;  %s1557_s2 = inlined_call_operand.vmem [shape: f32[16,384], index: 2, kind: input, shape index: {}]   ;;  %s1558_s3 = inlined_call_operand.vmem [shape: f32[16,384], index: 3, kind: input, shape index: {}]   ;;  %s1559_s4 = inlined_call_operand.vmem [shape: f32[1,384], index: 4, kind: input, shape index: {}]   ;;  %s1560_s5 = inlined_call_operand.vmem [shape: f32[2,16,384], index: 5, kind: output, shape index: {}]  }
   0x1 LB: > { %s1018_s19 = sadd.s32 4294967295, %s1238_s18   ;;  %p1022_p0 = scmp.ge.s32.totalorder %s1238_s18, 1  ;;  %s1238_s18 = sphi %s1278_s18, %s15_s18  }
   0x2   : > { %p187_p1 = scmp.lt.s32.totalorder %s1238_s18, 3 }
   0x4   : > { %p188_p2 = pnand %p1022_p0, %p187_p1 }
   0x5   : > { %p215_p3 = scmp.lt.s32.totalorder (!%p188_p2), %s1018_s19, 1  ;;  %s1240_s24 = smov (!%p188_p2), 91  }
   0x6   : > { %191 = sbr.rel (%p188_p2) target bundleno = 681 (0x2a9), region = 40  ;;  %s1241_s25 = smov (!%p188_p2), 92  }
   0x7   : > { %s1242_s26 = smov (!%p188_p2), 108   ;;  %s1243_s27 = smov (!%p188_p2), 109  }
   0x8   : > { %s1244_s28 = smov (!%p188_p2), 90   ;;  %s1245_s29 = smov (!%p188_p2), 110  }
   0x9   : > { %s1246_s30 = smov (!%p188_p2), 126   ;;  %s1247_s6 = smov (!%p188_p2), 127  }
   0xb   : > { %s1570_s19 = smov (!%p215_p3, %s1018_s19), 1  ;;  %vm250_vm0 = vcmask 1043456   ;;  %vm387_vm1 = vcmask 752640   ;;  %vm360_vm2 = vcmask 883712   ;;  %vm414_vm3 = vcmask 744448  }
   0xc   : > { %s1153_s20 = sshll.u32 %s1570_s19, 5  ;;  %vm441_vm4 = vcmask 736256   ;;  %vm333_vm5 = vcmask 891904   ;;  %vm306_vm6 = vcmask 900096   ;;  %vm252_vm7 = vcmask 1039360  }
   0xd   : > { %s219_s23 = scalar_lea.vmem %s1555_s0, %s1153_s20  ;;  %vm646_vm8 = vcmask 130048   ;;  %vm279_vm9 = vcmask 1031168  }
   0xe   : > { %v228_v0 = vld [vmem:[%s219_s23 + $0x10] sm:$0xff]  ;;  %v226_v1 = vld [vmem:[%s219_s23] sm:$0xff]  ;;  %v229_v2 = vld [vmem:[%s219_s23 + $0x18] sm:$0xff] }
   0xf   : > { %405 = vrot.lane.b32.xlu1 %v228_v0, %s1240_s24  ;;  %232 = vst [vmem:[#allocation2 + $0xc] sm:$0xff] %v228_v0  ;;  %401 = vrot.lane.b32.xlu0 %v226_v1, %s1240_s24  ;;  %v227_v3 = vld [vmem:[%s219_s23 + $0x8] sm:$0xff] }
  0x10   : > { %230 = vst [vmem:[#allocation2] sm:$0xff] %v226_v1  ;;  %374 = vrot.lane.b32.xlu2 %v226_v1, %s1241_s25 }
  0x11   : > { %233 = vst [vmem:[#allocation2 + $0x14] sm:$0xf] %v229_v2 }
  0x12   : > { %231 = vst [vmem:[#allocation2 + $0x8] sm:$0xf] %v227_v3 }
  0x17   : > { %407 = vrot.lane.b32.xlu1 %v229_v2, %s1240_s24  ;;  %403 = vrot.lane.b32.xlu0 %v227_v3, %s1240_s24 }
  0x18   : > { %376 = vrot.lane.b32.xlu2 %v227_v3, %s1241_s25 }
  0x1f   : > { %380 = vrot.lane.b32.xlu1 %v229_v2, %s1241_s25  ;;  %378 = vrot.lane.b32.xlu0 %v228_v0, %s1241_s25 }
  0x20   : > { %347 = vrot.lane.b32.xlu2 %v226_v1, %s1242_s26 }
  0x27   : > { %351 = vrot.lane.b32.xlu1 %v228_v0, %s1242_s26  ;;  %349 = vrot.lane.b32.xlu0 %v227_v3, %s1242_s26 }
  0x28   : > { %353 = vrot.lane.b32.xlu2 %v229_v2, %s1242_s26 }
  0x2f   : > { %322 = vrot.lane.b32.xlu1 %v227_v3, %s1243_s27  ;;  %320 = vrot.lane.b32.xlu0 %v226_v1, %s1243_s27 }
  0x30   : > { %324 = vrot.lane.b32.xlu2 %v228_v0, %s1243_s27 }
  0x37   : > { %428 = vrot.lane.b32.xlu1 %v226_v1, %s1244_s28  ;;  %326 = vrot.lane.b32.xlu0 %v229_v2, %s1243_s27 }
  0x38   : > { %430 = vrot.lane.b32.xlu2 %v227_v3, %s1244_s28 }
  0x3f   : > { %434 = vrot.lane.b32.xlu1 %v229_v2, %s1244_s28  ;;  %432 = vrot.lane.b32.xlu0 %v228_v0, %s1244_s28  ;;  %s1183_s28 = smul.u32 48, %s1570_s19 }
  0x40   : > { %293 = vrot.lane.b32.xlu2 %v226_v1, %s1245_s29 }
  0x47   : > { %297 = vrot.lane.b32.xlu1 %v228_v0, %s1245_s29  ;;  %295 = vrot.lane.b32.xlu0 %v227_v3, %s1245_s29 }
  0x48   : > { %299 = vrot.lane.b32.xlu2 %v229_v2, %s1245_s29 }
  0x4f   : > { %268 = vrot.lane.b32.xlu1 %v227_v3, %s1246_s30  ;;  %266 = vrot.lane.b32.xlu0 %v226_v1, %s1246_s30 }
  0x50   : > { %270 = vrot.lane.b32.xlu2 %v228_v0, %s1246_s30 }
  0x57   : > { %238 = vrot.lane.b32.xlu1 %v226_v1, %s1247_s6  ;;  %272 = vrot.lane.b32.xlu0 %v229_v2, %s1246_s30  ;;  %s1522_s30 = scalar_lea.vmem %s1560_s5, %s1183_s28 }
  0x58   : > { %240 = vrot.lane.b32.xlu2 %v227_v3, %s1247_s6 }
  0x5f   : > { %244 = vrot.lane.b32.xlu1 %v229_v2, %s1247_s6  ;;  %242 = vrot.lane.b32.xlu0 %v228_v0, %s1247_s6 }
  0x6a   : > { %v375_v4 = vpop.permute.xlu2 %374 }
  0x6b   : > { %v382_v5 = vrot.slane %v375_v4, 4 }
  0x72   : > { %v377_v6 = vpop.permute.xlu2 %376 }
  0x73   : > { %v383_v7 = vrot.slane %v377_v6, 4 }
  0x75   : > { %v386_v8 = vsel %vm250_vm0, %v382_v5, %v383_v7  ;;  %v389_v9 = vsel %vm387_vm1, %v377_v6, %v383_v7 }
  0x76   : > { %v388_v10 = vsel %vm387_vm1, %v375_v4, %v386_v8  ;;  %398 = vst [vmem:[#allocation2 + $0x98] sm:$0xf] %v389_v9 }
  0x77   : > { %397 = vst [vmem:[#allocation2 + $0x90] sm:$0xff] %v388_v10 }
  0x7a   : > { %v348_v11 = vpop.permute.xlu2 %347 }
  0x7b   : > { %v355_v46 = vrot.slane %v348_v11, 4 }
  0x7e   : > { %v1108_v55 = vld [vmem:[#allocation2 + $0x90] sm:$0xf]  ;;  %v1174_v56 = vld [vmem:[#allocation2 + $0x94] sm:$0xf] }
  0x81   : > { %v406_v12 = vpop.permute.xlu1 %405  ;;  %v402_v13 = vpop.permute.xlu0 %401 }
  0x82   : > { %v354_v14 = vpop.permute.xlu2 %353  ;;  %v411_v19 = vrot.slane %v406_v12, 4  ;;  %v409_v20 = vrot.slane %v402_v13, 4 }
  0x83   : > { %v358_v15 = vrot.slane %v354_v14, 4 }
  0x85   : > { %v365_v16 = vsel %vm360_vm2, %v354_v14, %v358_v15 }
  0x86   : > { %373 = vst [vmem:[#allocation2 + $0x8c] sm:$0xf] %v365_v16 }
  0x89   : > { %v408_v17 = vpop.permute.xlu1 %407  ;;  %v404_v18 = vpop.permute.xlu0 %403 }
  0x8a   : > { %v412_v21 = vrot.slane %v408_v17, 4  ;;  %v410_v22 = vrot.slane %v404_v18, 4  ;;  %v1296_v23 = vpop.permute.xlu2 %324 }
  0x8c   : > { %v417_v24 = vsel %vm250_vm0, %v411_v19, %v412_v21  ;;  %v419_v25 = vsel %vm414_vm3, %v408_v17, %v412_v21  ;;  %v413_v26 = vsel %vm250_vm0, %v409_v20, %v410_v22  ;;  %v416_v29 = vsel %vm414_vm3, %v404_v18, %v410_v22 }
  0x8d   : > { %v418_v27 = vsel %vm414_vm3, %v406_v12, %v417_v24  ;;  %427 = vst [vmem:[#allocation2 + $0xbc] sm:$0xf] %v419_v25  ;;  %v415_v28 = vsel %vm414_vm3, %v402_v13, %v413_v26 }
  0x8e   : > { %426 = vst [vmem:[#allocation2 + $0xb4] sm:$0xff] %v418_v27 }
  0x8f   : > { %424 = vst [vmem:[#allocation2 + $0xa8] sm:$0xff] %v415_v28 }
  0x90   : > { %425 = vst [vmem:[#allocation2 + $0xb0] sm:$0xf] %v416_v29 }
  0x91   : > { %v381_v30 = vpop.permute.xlu1 %380  ;;  %v379_v31 = vpop.permute.xlu0 %378 }
  0x92   : > { %v385_v32 = vrot.slane %v381_v30, 4  ;;  %v384_v33 = vrot.slane %v379_v31, 4  ;;  %v1300_v34 = vpop.permute.xlu2 %430 }
  0x93   : > { %v437_v35 = vrot.slane %v1300_v34, 4 }
  0x94   : > { %v392_v36 = vsel %vm387_vm1, %v381_v30, %v385_v32  ;;  %v390_v37 = vsel %vm250_vm0, %v384_v33, %v385_v32 }
  0x95   : > { %400 = vst [vmem:[#allocation2 + $0xa4] sm:$0xf] %v392_v36  ;;  %v391_v38 = vsel %vm387_vm1, %v379_v31, %v390_v37  ;;  %v1178_v39 = vld [vmem:[#allocation2 + $0xb0] sm:$0xf0]  ;;  %v1122_v40 = vld [vmem:[#allocation2 + $0xb4] sm:$0xf0]  ;;  %v443_v41 = vsel %vm441_vm4, %v1300_v34, %v437_v35 }
  0x96   : > { %399 = vst [vmem:[#allocation2 + $0x9c] sm:$0xff] %v391_v38  ;;  %v1120_v42 = vld [vmem:[#allocation2 + $0xa8] sm:$0xf]  ;;  %v1177_v43 = vld [vmem:[#allocation2 + $0xac] sm:$0xf] }
  0x97   : > { %v1121_v44 = vor.u32 %v1178_v39, %v1120_v42  ;;  %v1125_v45 = vor.u32 %v1177_v43, %v1122_v40  ;;  %452 = vst [vmem:[#allocation2 + $0xc8] sm:$0xf] %v443_v41 }
  0x99   : > { %650 = vmatpush.bf16.msra.mxu0 %v1121_v44  ;;  %678 = vmatpush.bf16.msra.mxu2 %v1125_v45  ;;  %v352_v47 = vpop.permute.xlu1 %351  ;;  %v350_v48 = vpop.permute.xlu0 %349 }
  0x9a   : > { %v357_v49 = vrot.slane %v352_v47, 4  ;;  %v356_v50 = vrot.slane %v350_v48, 4  ;;  %v1310_v51 = vpop.permute.xlu2 %293 }
  0x9b   : > { %v301_v42 = vrot.slane %v1310_v51, 4 }
  0x9c   : > { %v363_v52 = vsel %vm250_vm0, %v357_v49, %v358_v15  ;;  %v359_v53 = vsel %vm250_vm0, %v355_v46, %v356_v50  ;;  %v362_v54 = vsel %vm360_vm2, %v350_v48, %v356_v50  ;;  %v330_v15 = vrot.slane %v1296_v23, 4  ;;  %v1128_v48 = vld [vmem:[#allocation2 + $0xb0] sm:$0xf]  ;;  %v1154_v49 = vld [vmem:[%s1556_s1 + $0x4] sm:$0xf] }
  0x9d   : > { %v364_v57 = vsel %vm360_vm2, %v352_v47, %v363_v52  ;;  %v361_v58 = vsel %vm360_vm2, %v348_v11, %v359_v53  ;;  %371 = vst [vmem:[#allocation2 + $0x80] sm:$0xf] %v362_v54  ;;  %v1175_v59 = vld [vmem:[#allocation2 + $0x98] sm:$0xf0]  ;;  %v1110_v60 = vld [vmem:[#allocation2 + $0x9c] sm:$0xf0] }
  0x9e   : > { %372 = vst [vmem:[#allocation2 + $0x84] sm:$0xff] %v364_v57  ;;  %v1109_v61 = vor.u32 %v1175_v59, %v1108_v55  ;;  %v1113_v62 = vor.u32 %v1174_v56, %v1110_v60  ;;  %v1179_v47 = vld [vmem:[#allocation2 + $0xb8] sm:$0xf0]  ;;  %v1030_v50 = vld [vmem:[%s1556_s1 + $0x8] sm:$0xf0] }
  0x9f   : > { %370 = vst [vmem:[#allocation2 + $0x78] sm:$0xff] %v361_v58 }
  0xa0   : > { %651 = vmatpush.bf16.msra.mxu0 %v1109_v61  ;;  %679 = vmatpush.bf16.msra.mxu2 %v1113_v62 }
  0xa1   : > { %v323_v63 = vpop.permute.xlu1 %322  ;;  %v321_v0 = vpop.permute.xlu0 %320 }
  0xa2   : > { %v329_v1 = vrot.slane %v323_v63, 4  ;;  %v328_v2 = vrot.slane %v321_v0, 4  ;;  %v1317_v3 = vpop.permute.xlu2 %299 }
  0xa3   : > { %v304_v4 = vrot.slane %v1317_v3, 4 }
  0xa4   : > { %v335_v5 = vsel %vm333_vm5, %v323_v63, %v329_v1  ;;  %v332_v6 = vsel %vm250_vm0, %v328_v2, %v329_v1  ;;  %v1129_v1 = vor.u32 %v1179_v47, %v1128_v48 }
  0xa5   : > { %344 = vst [vmem:[#allocation2 + $0x68] sm:$0xf] %v335_v5  ;;  %v334_v7 = vsel %vm333_vm5, %v321_v0, %v332_v6  ;;  %v1172_v8 = vld [vmem:[#allocation2 + $0x80] sm:$0xf0]  ;;  %v1098_v9 = vld [vmem:[#allocation2 + $0x84] sm:$0xf0]  ;;  %v311_v10 = vsel %vm306_vm6, %v1317_v3, %v304_v4  ;;  %v1033_v3 = vor.u32 %v1154_v49, %v1030_v50 }
  0xa6   : > { %343 = vst [vmem:[#allocation2 + $0x60] sm:$0xff] %v334_v7  ;;  %v1096_v11 = vld [vmem:[#allocation2 + $0x78] sm:$0xf]  ;;  %v1171_v12 = vld [vmem:[#allocation2 + $0x7c] sm:$0xf] }
  0xa7   : > { %v1097_v13 = vor.u32 %v1172_v8, %v1096_v11  ;;  %v1101_v14 = vor.u32 %v1171_v12, %v1098_v9  ;;  %319 = vst [vmem:[#allocation2 + $0x5c] sm:$0xf] %v311_v10  ;;  %v1140_v0 = vld [vmem:[#allocation2 + $0xc8] sm:$0xf]  ;;  %v1116_v8 = vld [vmem:[#allocation2 + $0x98] sm:$0xf] }
  0xa8   : > { %v1104_v12 = vld [vmem:[#allocation2 + $0x80] sm:$0xf] }
  0xa9   : > { %652 = vmatpush.bf16.msra.mxu0 %v1097_v13  ;;  %680 = vmatpush.bf16.msra.mxu2 %v1101_v14  ;;  %v429_v16 = vpop.permute.xlu1 %428  ;;  %v327_v17 = vpop.permute.xlu0 %326  ;;  %v1173_v13 = vld [vmem:[#allocation2 + $0x88] sm:$0xf0] }
  0xaa   : > { %v436_v18 = vrot.slane %v429_v16, 4  ;;  %v331_v19 = vrot.slane %v327_v17, 4  ;;  %v1326_v20 = vpop.permute.xlu2 %270 }
  0xac   : > { %v440_v21 = vsel %vm250_vm0, %v436_v18, %v437_v35  ;;  %v336_v22 = vsel %vm250_vm0, %v330_v15, %v331_v19  ;;  %v338_v24 = vsel %vm333_vm5, %v327_v17, %v331_v19 }
  0xad   : > { %v442_v25 = vsel %vm441_vm4, %v429_v16, %v440_v21  ;;  %v337_v26 = vsel %vm333_vm5, %v1296_v23, %v336_v22  ;;  %346 = vst [vmem:[#allocation2 + $0x74] sm:$0xf] %v338_v24  ;;  %v1084_v23 = vld [vmem:[#allocation2 + $0x60] sm:$0xf]  ;;  %v1168_v36 = vld [vmem:[#allocation2 + $0x64] sm:$0xf]  ;;  %v1105_v24 = vor.u32 %v1173_v13, %v1104_v12 }
  0xae   : > { %451 = vst [vmem:[#allocation2 + $0xc0] sm:$0xff] %v442_v25  ;;  %v276_v22 = vrot.slane %v1326_v20, 4 }
  0xaf   : > { %345 = vst [vmem:[#allocation2 + $0x6c] sm:$0xff] %v337_v26 }
  0xb1   : > { %v435_v27 = vpop.permute.xlu1 %434  ;;  %v433_v28 = vpop.permute.xlu0 %432 }
  0xb2   : > { %v439_v29 = vrot.slane %v435_v27, 4  ;;  %v438_v30 = vrot.slane %v433_v28, 4  ;;  %v1336_v31 = vpop.permute.xlu2 %240 }
  0xb3   : > { %v247_v32 = vrot.slane %v1336_v31, 4 }
  0xb4   : > { %v446_v33 = vsel %vm441_vm4, %v435_v27, %v439_v29  ;;  %v444_v34 = vsel %vm250_vm0, %v438_v30, %v439_v29  ;;  %v1170_v27 = vld [vmem:[#allocation2 + $0x70] sm:$0xf0]  ;;  %v1092_v30 = vld [vmem:[#allocation2 + $0x68] sm:$0xf] }
  0xb5   : > { %454 = vst [vmem:[#allocation2 + $0xd4] sm:$0xf] %v446_v33  ;;  %v445_v35 = vsel %vm441_vm4, %v433_v28, %v444_v34  ;;  %v254_v37 = vsel %vm252_vm7, %v1336_v31, %v247_v32  ;;  %v1132_v55 = vld [vmem:[#allocation2 + $0xc0] sm:$0xf]  ;;  %v1180_v56 = vld [vmem:[#allocation2 + $0xc4] sm:$0xf] }
  0xb6   : > { %453 = vst [vmem:[#allocation2 + $0xcc] sm:$0xff] %v445_v35  ;;  %v1169_v38 = vld [vmem:[#allocation2 + $0x68] sm:$0xf0]  ;;  %v1086_v39 = vld [vmem:[#allocation2 + $0x6c] sm:$0xf0] }
  0xb7   : > { %v1085_v40 = vor.u32 %v1169_v38, %v1084_v23  ;;  %v1089_v41 = vor.u32 %v1168_v36, %v1086_v39  ;;  %263 = vst [vmem:[#allocation2 + $0x20] sm:$0xf] %v254_v37  ;;  %v1093_v23 = vor.u32 %v1170_v27, %v1092_v30  ;;  %v1167_v39 = vld [vmem:[#allocation2 + $0x58] sm:$0xf0] }
  0xb9   : > { %653 = vmatpush.bf16.msra.mxu0 %v1085_v40  ;;  %681 = vmatpush.bf16.msra.mxu2 %v1089_v41  ;;  %v298_v43 = vpop.permute.xlu1 %297  ;;  %v296_v44 = vpop.permute.xlu0 %295 }
  0xba   : > { %v303_v45 = vrot.slane %v298_v43, 4  ;;  %v302_v46 = vrot.slane %v296_v44, 4 }
  0xbc   : > { %v309_v52 = vsel %vm250_vm0, %v303_v45, %v304_v4  ;;  %v305_v53 = vsel %vm250_vm0, %v301_v42, %v302_v46  ;;  %v308_v54 = vsel %vm306_vm6, %v296_v44, %v302_v46  ;;  %v1182_v57 = vld [vmem:[#allocation2 + $0xd0] sm:$0xf0]  ;;  %v1176_v4 = vld [vmem:[#allocation2 + $0xa0] sm:$0xf0] }
  0xbd   : > { %v310_v58 = vsel %vm306_vm6, %v298_v43, %v309_v52  ;;  %v307_v59 = vsel %vm306_vm6, %v1310_v51, %v305_v53  ;;  %317 = vst [vmem:[#allocation2 + $0x50] sm:$0xf] %v308_v54  ;;  %v1181_v60 = vld [vmem:[#allocation2 + $0xc8] sm:$0xf0]  ;;  %v1134_v61 = vld [vmem:[#allocation2 + $0xcc] sm:$0xf0]  ;;  %v1141_v2 = vor.u32 %v1182_v57, %v1140_v0  ;;  %v1117_v9 = vor.u32 %v1176_v4, %v1116_v8 }
  0xbe   : > { %318 = vst [vmem:[#allocation2 + $0x54] sm:$0xff] %v310_v58  ;;  %v1133_v62 = vor.u32 %v1181_v60, %v1132_v55  ;;  %v1137_v63 = vor.u32 %v1180_v56, %v1134_v61  ;;  %v1056_v55 = vld [vmem:[#allocation2 + $0x20] sm:$0xf]  ;;  %v1157_v57 = vld [vmem:[#allocation2 + $0x8] sm:$0xf0] }
  0xbf   : > { %316 = vst [vmem:[#allocation2 + $0x48] sm:$0xff] %v307_v59  ;;  %v1036_v56 = vld [vmem:[#allocation2] sm:$0xf]  ;;  %v1156_v58 = vld [vmem:[#allocation2 + $0x4] sm:$0xf] }
  0xc0   : > { %671 = vmatpush.bf16.msra.mxu1 %v1133_v62  ;;  %699 = vmatpush.bf16.msra.mxu3 %v1137_v63  ;;  %v1038_v59 = vld [vmem:[#allocation2 + $0xc] sm:$0xf0]  ;;  %v1044_v60 = vld [vmem:[#allocation2 + $0x8] sm:$0xf]  ;;  %v1158_v63 = vld [vmem:[#allocation2 + $0x10] sm:$0xf0]  ;;  %v1037_v8 = vor.u32 %v1157_v57, %v1036_v56 }
  0xc1   : > { %v269_v5 = vpop.permute.xlu1 %268  ;;  %v267_v51 = vpop.permute.xlu0 %266 }
  0xc2   : > { %v275_v6 = vrot.slane %v269_v5, 4  ;;  %v274_v7 = vrot.slane %v267_v51, 4 }
  0xc3   : > { %1143 = vmatmul.msk.bf16.vlgmr.msra.gmra.mxu3 %vm646_vm8, %v1033_v3  ;;  %1142 = vmatmul.msk.bf16.vlgmr.msra.gmra.mxu1 %vm646_vm8, %v1033_v3 }
  0xc4   : > { %706 = vmatpush.bf16.msrb.mxu1 %v1129_v1  ;;  %727 = vmatpush.bf16.msrb.mxu3 %v1141_v2  ;;  %v281_v10 = vsel %vm279_vm9, %v269_v5, %v275_v6  ;;  %v278_v11 = vsel %vm250_vm0, %v274_v7, %v275_v6  ;;  %v1080_v38 = vld [vmem:[#allocation2 + $0x50] sm:$0xf]  ;;  %v1028_v6 = vld [vmem:[%s1556_s1] sm:$0xf]  ;;  %v1155_v7 = vld [vmem:[%s1556_s1 + $0x4] sm:$0xf0] }
  0xc5   : > { %290 = vst [vmem:[#allocation2 + $0x38] sm:$0xf] %v281_v10  ;;  %v280_v14 = vsel %vm279_vm9, %v267_v51, %v278_v11  ;;  %v1166_v15 = vld [vmem:[#allocation2 + $0x50] sm:$0xf0]  ;;  %v1074_v16 = vld [vmem:[#allocation2 + $0x54] sm:$0xf0]  ;;  %v1081_v40 = vor.u32 %v1167_v39, %v1080_v38  ;;  %v1045_v51 = vor.u32 %v1158_v63, %v1044_v60  ;;  %v1029_v10 = vor.u32 %v1155_v7, %v1028_v6 }
  0xc6   : > { %289 = vst [vmem:[#allocation2 + $0x30] sm:$0xff] %v280_v14  ;;  %v1072_v17 = vld [vmem:[#allocation2 + $0x48] sm:$0xf]  ;;  %v1165_v18 = vld [vmem:[#allocation2 + $0x4c] sm:$0xf] }
  0xc7   : > { %v1073_v19 = vor.u32 %v1166_v15, %v1072_v17  ;;  %v1077_v21 = vor.u32 %v1165_v18, %v1074_v16  ;;  %v734_v17 = vld [vmem:[%s1559_s4] sm:$0x7] }
  0xc8   : > { %707 = vmatpush.bf16.msrb.mxu1 %v1117_v9  ;;  %v1041_v9 = vor.u32 %v1156_v58, %v1038_v59 }
  0xc9   : > { %654 = vmatpush.bf16.msra.mxu0 %v1073_v19  ;;  %682 = vmatpush.bf16.msra.mxu2 %v1077_v21  ;;  %v239_v25 = vpop.permute.xlu1 %238  ;;  %v273_v26 = vpop.permute.xlu0 %272  ;;  %v736_v21 = vperm.slane %v734_v17, 0 }
  0xca   : > { %v246_v28 = vrot.slane %v239_v25, 4  ;;  %v277_v29 = vrot.slane %v273_v26, 4 }
  0xcc   : > { %708 = vmatpush.bf16.msrb.mxu1 %v1105_v24  ;;  %v251_v33 = vsel %vm250_vm0, %v246_v28, %v247_v32  ;;  %v282_v34 = vsel %vm250_vm0, %v276_v22, %v277_v29  ;;  %v284_v35 = vsel %vm279_vm9, %v273_v26, %v277_v29  ;;  %v1068_v45 = vld [vmem:[#allocation2 + $0x38] sm:$0xf]  ;;  %v738_v24 = vperm.slane %v734_v17, 2 }
  0xcd   : > { %v253_v36 = vsel %vm252_vm7, %v239_v25, %v251_v33  ;;  %v283_v37 = vsel %vm279_vm9, %v1326_v20, %v282_v34  ;;  %292 = vst [vmem:[#allocation2 + $0x44] sm:$0xf] %v284_v35  ;;  %v1060_v48 = vld [vmem:[#allocation2 + $0x30] sm:$0xf]  ;;  %v1162_v49 = vld [vmem:[#allocation2 + $0x34] sm:$0xf] }
  0xce   : > { %262 = vst [vmem:[#allocation2 + $0x18] sm:$0xff] %v253_v36  ;;  %v737_v25 = vperm.slane %v734_v17, 1 }
  0xcf   : > { %291 = vst [vmem:[#allocation2 + $0x3c] sm:$0xff] %v283_v37 }
  0xd0   : > { %709 = vmatpush.bf16.msrb.mxu1 %v1093_v23 }
  0xd1   : > { %v245_v31 = vpop.permute.xlu1 %244  ;;  %v243_v41 = vpop.permute.xlu0 %242 }
  0xd2   : > { %v249_v32 = vrot.slane %v245_v31, 4  ;;  %v248_v42 = vrot.slane %v243_v41, 4 }
  0xd3   : > { %1144 = vmatmul.msk.bf16.vlgmr.msrb.gmra.mxu3 %vm646_vm8, %v1033_v3 }
  0xd4   : > { %710 = vmatpush.bf16.msrb.mxu1 %v1081_v40  ;;  %v257_v43 = vsel %vm252_vm7, %v245_v31, %v249_v32  ;;  %v255_v44 = vsel %vm250_vm0, %v248_v42, %v249_v32  ;;  %v1164_v20 = vld [vmem:[#allocation2 + $0x40] sm:$0xf0] }
  0xd5   : > { %265 = vst [vmem:[#allocation2 + $0x2c] sm:$0xf] %v257_v43  ;;  %v256_v46 = vsel %vm252_vm7, %v243_v41, %v255_v44  ;;  %v1069_v47 = vor.u32 %v1164_v20, %v1068_v45  ;;  %v1048_v62 = vld [vmem:[#allocation2 + $0x18] sm:$0xf]  ;;  %v1159_v2 = vld [vmem:[#allocation2 + $0x1c] sm:$0xf] }
  0xd6   : > { %264 = vst [vmem:[#allocation2 + $0x24] sm:$0xff] %v256_v46  ;;  %v1163_v50 = vld [vmem:[#allocation2 + $0x38] sm:$0xf0]  ;;  %v1062_v52 = vld [vmem:[#allocation2 + $0x3c] sm:$0xf0] }
  0xd7   : > { %v1061_v53 = vor.u32 %v1163_v50, %v1060_v48  ;;  %v1065_v54 = vor.u32 %v1162_v49, %v1062_v52 }
  0xd8   : > { %711 = vmatpush.bf16.msrb.mxu1 %v1069_v47 }
  0xd9   : > { %655 = vmatpush.bf16.msra.mxu0 %v1061_v53  ;;  %683 = vmatpush.bf16.msra.mxu2 %v1065_v54 }
  0xdc   : > { %v1161_v61 = vld [vmem:[#allocation2 + $0x28] sm:$0xf0] }
  0xdd   : > { %v1057_v0 = vor.u32 %v1161_v61, %v1056_v55  ;;  %v1160_v1 = vld [vmem:[#allocation2 + $0x20] sm:$0xf0]  ;;  %v1050_v3 = vld [vmem:[#allocation2 + $0x24] sm:$0xf0] }
  0xde   : > { %v1049_v4 = vor.u32 %v1160_v1, %v1048_v62  ;;  %v1053_v5 = vor.u32 %v1159_v2, %v1050_v3 }
  0xdf   : > { %712 = vmatpush.bf16.msrb.mxu1 %v1057_v0 }
  0xe0   : > { %656 = vmatpush.bf16.msra.mxu0 %v1049_v4  ;;  %684 = vmatpush.bf16.msra.mxu2 %v1053_v5 }
  0xe3   : > { %713 = vmatpush.bf16.msrb.mxu1 %v1045_v51 }
  0xe4   : > { %657 = vmatpush.bf16.msra.mxu0 %v1037_v8  ;;  %685 = vmatpush.bf16.msra.mxu2 %v1041_v9 }
  0xe6   : > { %714 = vmatmul.bf16.vlgmr.msrb.gmra.mxu1 %v1029_v10 }
  0xe7   : > { %658 = vmatmul.bf16.vlgmr.msra.gmra.mxu0 %v1029_v10  ;;  %686 = vmatmul.bf16.vlgmr.msra.gmra.mxu2 %v1029_v10 }
 0x140   : > { %v673_v12 = vpop.f32.mrf.mxu1 }
 0x146   : > { %v701_v11 = vpop.f32.mrf.mxu3 }
 0x148   : > { %v675_v14 = vpop.f32.mrf.mxu1 }
 0x14e   : > { %v703_v13 = vpop.f32.mrf.mxu3 }
 0x156   : > { %v729_v15 = vpop.f32.mrf.mxu3 }
 0x15e   : > { %v731_v23 = vpop.f32.mrf.mxu3 }
 0x163   : > { %v715_v18 = vpop.f32.mrf.mxu1 }
 0x164   : > { %v659_v16 = vpop.f32.mrf.mxu0  ;;  %v1388_v22 = vadd.f32 %v729_v15, %v715_v18  ;;  %v813_v18 = vld [vmem:[%s1557_s2] sm:$0xff] }
 0x165   : > { %v1386_v19 = vadd.f32 %v673_v12, %v659_v16 }
 0x166   : > { %v744_v28 = vmul.f32 %v738_v24, %v1388_v22 }
 0x167   : > { %v742_v27 = vmul.f32 %v736_v21, %v1386_v19 }
 0x168   : > { %v765_v37 = vmul.f32 %v744_v28, %v744_v28 }
 0x169   : > { %v763_v36 = vmul.f32 %v742_v27, %v742_v27 }
 0x16a   : > { %v687_v26 = vpop.f32.mrf.mxu2 }
 0x16b   : > { %v1392_v29 = vadd.f32 %v701_v11, %v687_v26  ;;  %v717_v35 = vpop.f32.mrf.mxu1  ;;  %v814_v26 = vld [vmem:[%s1557_s2 + $0x8] sm:$0xff] }
 0x16c   : > { %v661_v30 = vpop.f32.mrf.mxu0  ;;  %v1398_v32 = vadd.f32 %v731_v23, %v717_v35  ;;  %v825_v35 = vld [vmem:[%s1558_s3] sm:$0xff] }
 0x16d   : > { %v743_v33 = vmul.f32 %v737_v25, %v1392_v29  ;;  %v1395_v34 = vadd.f32 %v675_v14, %v661_v30 }
 0x16e   : > { %v747_v46 = vmul.f32 %v738_v24, %v1398_v32 }
 0x16f   : > { %v748_v38 = vadd.f32 %v743_v33, %v742_v27  ;;  %v764_v39 = vmul.f32 %v743_v33, %v743_v33  ;;  %v745_v31 = vmul.f32 %v736_v21, %v1395_v34  ;;  %v817_v33 = vld [vmem:[%s1557_s2 + $0x20] sm:$0xff] }
 0x170   : > { %v768_v53 = vmul.f32 %v747_v46, %v747_v46 }
 0x171   : > { %v769_v40 = vadd.f32 %v764_v39, %v763_v36  ;;  %v749_v41 = vadd.f32 %v748_v38, %v744_v28  ;;  %v766_v20 = vmul.f32 %v745_v31, %v745_v31  ;;  %v827_v38 = vld [vmem:[%s1558_s3 + $0x10] sm:$0xff]  ;;  %v828_v39 = vld [vmem:[%s1558_s3 + $0x18] sm:$0xff] }
 0x172   : > { %v689_v42 = vpop.f32.mrf.mxu2 }
 0x173   : > { %v1400_v43 = vadd.f32 %v703_v13, %v689_v42  ;;  %v770_v44 = vadd.f32 %v769_v40, %v765_v37  ;;  %v750_v45 = vadd.f32 %v749_v41, %v745_v31  ;;  %v826_v37 = vld [vmem:[%s1558_s3 + $0x8] sm:$0xff]  ;;  %v829_v42 = vld [vmem:[%s1558_s3 + $0x20] sm:$0xff] }
 0x175   : > { %v746_v47 = vmul.f32 %v737_v25, %v1400_v43  ;;  %v771_v50 = vadd.f32 %v770_v44, %v766_v20 }
 0x177   : > { %v767_v48 = vmul.f32 %v746_v47, %v746_v47  ;;  %v751_v49 = vadd.f32 %v750_v45, %v746_v47 }
 0x179   : > { %v752_v52 = vadd.f32 %v751_v49, %v747_v46  ;;  %v772_v54 = vadd.f32 %v771_v50, %v767_v48 }
 0x17b   : > { %753 = vadd.xlane.f32.xlu2 %v752_v52  ;;  %v773_v55 = vadd.f32 %v772_v54, %v768_v53 }
 0x17d   : > { %774 = vadd.xlane.f32.xlu0 %v773_v55 }
 0x1ee   : > { %v754_v56 = vpop.xlane.xlu2 %753 }
 0x1ef   : > { %v755_v57 = vrot.slane %v754_v56, 4 }
 0x1f0   : > { %v775_v58 = vpop.xlane.xlu0 %774 }
 0x1f1   : > { %v756_v59 = vadd.f32 %v755_v57, %v754_v56  ;;  %v776_v60 = vrot.slane %v775_v58, 4 }
 0x1f3   : > { %v757_v61 = vrot.slane %v756_v59, 2  ;;  %v777_v62 = vadd.f32 %v776_v60, %v775_v58 }
 0x1f5   : > { %v778_v63 = vrot.slane %v777_v62, 2  ;;  %v758_v0 = vadd.f32 %v757_v61, %v756_v59 }
 0x1f7   : > { %v779_v1 = vadd.f32 %v778_v63, %v777_v62  ;;  %v759_v2 = vrot.slane %v758_v0, 1 }
 0x1f9   : > { %v760_v3 = vadd.f32 %v759_v2, %v758_v0  ;;  %v780_v4 = vrot.slane %v779_v1, 1 }
 0x1fb   : > { %1184 = vpush %v760_v3  ;;  %v781_v5 = vadd.f32 %v780_v4, %v779_v1 }
 0x1fd   : > { %1186 = vpush %v781_v5 }
 0x22c   : > { %s1185_s17 = spop %1184 }
 0x22d   : > { %s762_s20 = smul.f32 0.00024414063, %s1185_s17 }
 0x22e   : > { %s1187_s21 = spop %1186 }
 0x22f   : > { %s784_s22 = smul.f32 %s762_s20, %s762_s20  ;;  %v799_v13 = vstv %s762_s20 }
 0x230   : > { %s783_s23 = smul.f32 0.00024414063, %s1187_s21  ;;  %v800_v14 = vsub.f32 %v1386_v19, %v799_v13  ;;  %v801_v15 = vsub.f32 %v1392_v29, %v799_v13  ;;  %v802_v16 = vsub.f32 %v1388_v22, %v799_v13  ;;  %v803_v17 = vsub.f32 %v1395_v34, %v799_v13  ;;  %v815_v19 = vld [vmem:[%s1557_s2 + $0x10] sm:$0xff]  ;;  %v816_v22 = vld [vmem:[%s1557_s2 + $0x18] sm:$0xff]  ;;  %v818_v34 = vld [vmem:[%s1557_s2 + $0x28] sm:$0xff] }
 0x231   : > { %v804_v21 = vsub.f32 %v1400_v43, %v799_v13  ;;  %v805_v24 = vsub.f32 %v1398_v32, %v799_v13  ;;  %v830_v43 = vld [vmem:[%s1558_s3 + $0x28] sm:$0xff] }
 0x232   : > { %s785_s24 = ssub.f32 %s783_s23, %s784_s22 }
 0x234   : > { %s786_s25 = sadd.f32 1e-05, %s785_s24 }
 0x236   : > { %v787_v51 = vstv %s786_s25 }
 0x237   : > { %1206 = vrsqrt.f32 %v787_v51  ;;  %vm794_vm11 = vweird.f32 %v787_v51 }
 0x23d   : > { %v1207_v6 = vpop.eup %1206 }
 0x23e   : > { %v789_v7 = vmul.f32 %v1207_v6, %v787_v51  ;;  %vm795_vm10 = vweird.f32 %v1207_v6 }
 0x23f   : > { %vm796_vm12 = vmor %vm794_vm11, %vm795_vm10 }
 0x240   : > { %v790_v8 = vmul.f32 %v1207_v6, %v789_v7 }
 0x242   : > { %v791_v9 = vmul.f32 0.5, %v790_v8 }
 0x244   : > { %v792_v10 = vsub.f32 1.5, %v791_v9 }
 0x246   : > { %v793_v11 = vmul.f32 %v1207_v6, %v792_v10 }
 0x248   : > { %v797_v12 = vsel %vm796_vm12, %v1207_v6, %v793_v11 }
 0x249   : > { %1188 = vpush %v797_v12 }
 0x27a   : > { %s1189_s26 = spop %1188 }
 0x27b   : > { %v806_v25 = vstv %s1189_s26 }
 0x27c   : > { %v807_v27 = vmul.f32 %v806_v25, %v800_v14  ;;  %v808_v28 = vmul.f32 %v806_v25, %v801_v15  ;;  %v809_v29 = vmul.f32 %v806_v25, %v802_v16  ;;  %v810_v30 = vmul.f32 %v806_v25, %v803_v17 }
 0x27d   : > { %v811_v23 = vmul.f32 %v806_v25, %v804_v21  ;;  %v812_v36 = vmul.f32 %v806_v25, %v805_v24 }
 0x27e   : > { %v819_v40 = vmul.f32 %v813_v18, %v807_v27  ;;  %v820_v31 = vmul.f32 %v814_v26, %v808_v28  ;;  %v821_v41 = vmul.f32 %v815_v19, %v809_v29  ;;  %v822_v32 = vmul.f32 %v816_v22, %v810_v30 }
 0x27f   : > { %v823_v44 = vmul.f32 %v817_v33, %v811_v23  ;;  %v824_v45 = vmul.f32 %v818_v34, %v812_v36 }
 0x280   : > { %v1446_v20 = vadd.f32 %v825_v35, %v819_v40  ;;  %v1448_v46 = vadd.f32 %v826_v37, %v820_v31  ;;  %v1450_v47 = vadd.f32 %v827_v38, %v821_v41  ;;  %v1452_v48 = vadd.f32 %v828_v39, %v822_v32 }
 0x281   : > { %v1454_v49 = vadd.f32 %v829_v42, %v823_v44  ;;  %v1456_v50 = vadd.f32 %v830_v43, %v824_v45 }
 0x282   : > { %v1145_v52 = vmul.f32 -1.442695, %v1446_v20  ;;  %v1146_v53 = vmul.f32 -1.442695, %v1448_v46  ;;  %v1147_v54 = vmul.f32 -1.442695, %v1450_v47 }
 0x283   : > { %v1148_v55 = vmul.f32 -1.442695, %v1452_v48  ;;  %v1149_v56 = vmul.f32 -1.442695, %v1454_v49  ;;  %v1150_v57 = vmul.f32 -1.442695, %v1456_v50 }
 0x284   : > { %1208 = vpow2.f32 %v1145_v52 }
 0x285   : > { %1210 = vpow2.f32 %v1146_v53 }
 0x286   : > { %1212 = vpow2.f32 %v1147_v54 }
 0x287   : > { %1214 = vpow2.f32 %v1148_v55 }
 0x288   : > { %1216 = vpow2.f32 %v1149_v56 }
 0x289   : > { %1218 = vpow2.f32 %v1150_v57 }
 0x28a   : > { %v1209_v58 = vpop.eup %1208 }
 0x28b   : > { %v1211_v59 = vpop.eup %1210  ;;  %v855_v60 = vadd.f32 1.0, %v1209_v58 }
 0x28c   : > { %v1213_v61 = vpop.eup %1212  ;;  %v1464_v62 = vadd.f32 1.0, %v1211_v59 }
 0x28d   : > { %v1215_v63 = vpop.eup %1214  ;;  %v1466_v0 = vadd.f32 1.0, %v1213_v61  ;;  %1220 = vrcp.f32 %v855_v60  ;;  %v870_v5 = vand.u32 2147483647, %v855_v60  ;;  %v872_v51 = vand.u32 2147483648, %v855_v60 }
 0x28e   : > { %v1217_v1 = vpop.eup %1216  ;;  %v1468_v2 = vadd.f32 1.0, %v1215_v63  ;;  %1222 = vrcp.f32 %v1464_v62  ;;  %v885_v7 = vand.u32 2147483647, %v1464_v62  ;;  %v887_v8 = vand.u32 2147483648, %v1464_v62 }
 0x28f   : > { %v1219_v3 = vpop.eup %1218  ;;  %v1471_v4 = vadd.f32 1.0, %v1217_v1  ;;  %1224 = vrcp.f32 %v1466_v0  ;;  %vm866_vm13 = vweird.f32 %v855_v60  ;;  %v900_v10 = vand.u32 2147483647, %v1466_v0 }
 0x290   : > { %v1474_v6 = vadd.f32 1.0, %v1219_v3  ;;  %1226 = vrcp.f32 %v1468_v2  ;;  %v902_v11 = vand.u32 2147483648, %v1466_v0  ;;  %vm1482_vm14 = vcmp.eq.f32.partialorder %v870_v5, 8.507059e+37 }
 0x291   : > { %1228 = vrcp.f32 %v1471_v4  ;;  %vm881_vm15 = vweird.f32 %v1464_v62  ;;  %v917_v15 = vand.u32 2147483648, %v1468_v2  ;;  %v873_v16 = vor.u32 1.1754944e-38, %v872_v51 }
 0x292   : > { %vm896_vm0 = vweird.f32 %v1466_v0  ;;  %v915_v18 = vand.u32 2147483647, %v1468_v2  ;;  %vm1491_vm1 = vcmp.eq.f32.partialorder %v885_v7, 8.507059e+37  ;;  %v888_v26 = vor.u32 1.1754944e-38, %v887_v8 }
 0x293   : > { %v1221_v9 = vpop.eup %1220  ;;  %1230 = vrcp.f32 %v1474_v6  ;;  %vm1497_vm2 = vcmp.eq.f32.partialorder %v900_v10, 8.507059e+37  ;;  %v903_v28 = vor.u32 1.1754944e-38, %v902_v11  ;;  %vm911_vm3 = vweird.f32 %v1468_v2 }
 0x294   : > { %v1223_v12 = vpop.eup %1222  ;;  %v862_v13 = vmul.f32 %v1221_v9, %v855_v60  ;;  %vm867_vm4 = vweird.f32 %v1221_v9  ;;  %v918_v33 = vor.u32 1.1754944e-38, %v917_v15  ;;  %vm926_vm5 = vweird.f32 %v1471_v4 }
 0x295   : > { %v877_v17 = vmul.f32 %v1223_v12, %v1464_v62  ;;  %v1225_v21 = vpop.eup %1224  ;;  %vm882_vm6 = vweird.f32 %v1223_v12  ;;  %vm1504_vm7 = vcmp.eq.f32.partialorder %v915_v18, 8.507059e+37  ;;  %v930_v40 = vand.u32 2147483647, %v1471_v4  ;;  %vm868_vm8 = vmor %vm866_vm13, %vm867_vm4 }
 0x296   : > { %v863_v24 = vsub.f32 1.0, %v862_v13  ;;  %v892_v22 = vmul.f32 %v1225_v21, %v1466_v0  ;;  %v1227_v29 = vpop.eup %1226  ;;  %v932_v31 = vand.u32 2147483648, %v1471_v4  ;;  %vm897_vm9 = vweird.f32 %v1225_v21  ;;  %vm883_vm10 = vmor %vm881_vm15, %vm882_vm6 }
 0x297   : > { %v878_v19 = vsub.f32 1.0, %v877_v17  ;;  %v1229_v34 = vpop.eup %1228  ;;  %v907_v36 = vmul.f32 %v1227_v29, %v1468_v2  ;;  %vm912_vm11 = vweird.f32 %v1227_v29  ;;  %v945_v52 = vand.u32 2147483647, %v1474_v6  ;;  %vm898_vm12 = vmor %vm896_vm0, %vm897_vm9 }
 0x298   : > { %v864_v30 = vmul.f32 %v1221_v9, %v863_v24  ;;  %v893_v23 = vsub.f32 1.0, %v892_v22  ;;  %v922_v39 = vmul.f32 %v1229_v34, %v1471_v4  ;;  %vm927_vm13 = vweird.f32 %v1229_v34 }
 0x299   : > { %v879_v35 = vmul.f32 %v1223_v12, %v878_v19  ;;  %v908_v42 = vsub.f32 1.0, %v907_v36  ;;  %v1231_v43 = vpop.eup %1230  ;;  %vm931_vm15 = vcmp.eq.f32.partialorder %v930_v40, 8.507059e+37  ;;  %vm928_vm0 = vmor %vm926_vm5, %vm927_vm13  ;;  %v933_v51 = vor.u32 1.1754944e-38, %v932_v31 }
 0x29a   : > { %v865_v38 = vadd.f32 %v1221_v9, %v864_v30  ;;  %v894_v32 = vmul.f32 %v1225_v21, %v893_v23  ;;  %v923_v45 = vsub.f32 1.0, %v922_v39  ;;  %v937_v59 = vmul.f32 %v1231_v43, %v1474_v6 }
 0x29b   : > { %v880_v41 = vadd.f32 %v1223_v12, %v879_v35  ;;  %v909_v56 = vmul.f32 %v1227_v29, %v908_v42  ;;  %vm946_vm4 = vcmp.eq.f32.partialorder %v945_v52, 8.507059e+37 }
 0x29c   : > { %v869_v44 = vsel %vm868_vm8, %v1221_v9, %v865_v38  ;;  %v895_v55 = vadd.f32 %v1225_v21, %v894_v32  ;;  %v924_v58 = vmul.f32 %v1229_v34, %v923_v45  ;;  %v938_v3 = vsub.f32 1.0, %v937_v59 }
 0x29d   : > { %v874_v53 = vsel %vm1482_vm14, %v873_v16, %v869_v44  ;;  %v884_v54 = vsel %vm883_vm10, %v1223_v12, %v880_v41  ;;  %v910_v61 = vadd.f32 %v1227_v29, %v909_v56  ;;  %vm913_vm14 = vmor %vm911_vm3, %vm912_vm11 }
 0x29e   : > { %v889_v57 = vsel %vm1491_vm1, %v888_v26, %v884_v54  ;;  %v899_v60 = vsel %vm898_vm12, %v1225_v21, %v895_v55  ;;  %v951_v62 = vmul.f32 %v874_v53, %v1446_v20  ;;  %v925_v0 = vadd.f32 %v1229_v34, %v924_v58 }
 0x29f   : > { %v952_v63 = vmul.f32 %v889_v57, %v1448_v46  ;;  %v904_v1 = vsel %vm1497_vm2, %v903_v28, %v899_v60  ;;  %v914_v5 = vsel %vm913_vm14, %v1227_v29, %v910_v61  ;;  %v947_v20 = vand.u32 2147483648, %v1474_v6 }
 0x2a0   : > { %v953_v46 = vmul.f32 %v904_v1, %v1450_v47  ;;  %957 = vst [vmem:[%s1522_s30] sm:$0xff] %v951_v62  ;;  %v919_v7 = vsel %vm1504_vm7, %v918_v33, %v914_v5  ;;  %v929_v2 = vsel %vm928_vm0, %v1229_v34, %v925_v0  ;;  %v939_v8 = vmul.f32 %v1231_v43, %v938_v3 }
 0x2a1   : > { %vm942_vm1 = vweird.f32 %v1231_v43  ;;  %958 = vst [vmem:[%s1522_s30 + $0x8] sm:$0xff] %v952_v63  ;;  %v934_v9 = vsel %vm931_vm15, %v933_v51, %v929_v2  ;;  %v954_v4 = vmul.f32 %v919_v7, %v1452_v48  ;;  %vm941_vm2 = vweird.f32 %v1474_v6 }
 0x2a2   : > { %959 = vst [vmem:[%s1522_s30 + $0x10] sm:$0xff] %v953_v46  ;;  %v940_v10 = vadd.f32 %v1231_v43, %v939_v8  ;;  %v955_v11 = vmul.f32 %v934_v9, %v1454_v49  ;;  %vm943_vm3 = vmor %vm941_vm2, %vm942_vm1  ;;  %v948_v47 = vor.u32 1.1754944e-38, %v947_v20 }
 0x2a3   : > { %960 = vst [vmem:[%s1522_s30 + $0x18] sm:$0xff] %v954_v4 }
 0x2a4   : > { %v944_v12 = vsel %vm943_vm3, %v1231_v43, %v940_v10  ;;  %961 = vst [vmem:[%s1522_s30 + $0x20] sm:$0xff] %v955_v11 }
 0x2a5   : > { %v949_v13 = vsel %vm946_vm4, %v948_v47, %v944_v12 }
 0x2a6   : > { %v956_v14 = vmul.f32 %v949_v13, %v1456_v50 }
 0x2a8   : > { %962 = vst [vmem:[%s1522_s30 + $0x28] sm:$0xff] %v956_v14 }
 0x2a9 PF: > { %s15_s18 = sadd.s32 1, %s1238_s18  }
 0x2aa   : > { %p12_p4 = scmp.ge.s32.totalorder %s15_s18, 4  }
 0x2ac   :  { %14 = sbr.rel (!%p12_p4) target bundleno = 1 (0x1), region = 70 }

</bundles_post_ra>
